<compile_context>
chip_gen: v5e
topology: v5e:2x2
jax: 0.10.0
libtpu: 0.0.40
codegen_flags: <defaults>
</compile_context>

<pallas_src>
import functools

import jax
import jax.numpy as jnp
from jax.experimental import pallas as pl
from jax.experimental.pallas import tpu as pltpu


def _round_up(x, m):
    return ((x + m - 1) // m) * m


# ------------------------------ Pallas kernel ------------------------------ #

def _rel_gcn_kernel(c_out,
                    dst_ref, combo_ref, norm_ref,
                    rel_ref, in_w_ref, out_w_ref, x_ref, w_loop_ref, bias_ref, w_rel_ref,
                    x_out_ref, rel_out_ref,
                    s_ref, table_ref, row_iota_ref, col_iota_ref):
    """Edge-tiled norm-weighted (dst x type/dir) count scatter; table/BN/rel epilogue."""
    k = pl.program_id(0)
    n_tiles = pl.num_programs(0)
    num_nodes, e_tile = row_iota_ref.shape
    r4 = s_ref.shape[1]          # 2 * padded relation count (type x direction combos)
    r2p = rel_ref.shape[0]
    c_pad = x_out_ref.shape[1]

    # ---------------- prologue (k == 0): invariants + message table ---------------- #
    @pl.when(k == 0)
    def _prologue():
        s_ref[...] = jnp.zeros_like(s_ref)
        # grid-invariant iotas materialized once instead of regenerated per grid step
        row_iota_ref[...] = jax.lax.broadcasted_iota(jnp.int32, (num_nodes, e_tile), 0)
        col_iota_ref[...] = jax.lax.broadcasted_iota(jnp.int32, (e_tile, r4), 1)

        # softmax(rel[t] @ W_dir) is edge-independent: build the [2*r2p, c_pad] table
        # ONCE. Padded output lanes (>= c_out) get -1e30 (finite) so exp underflows to 0
        # and the softmax denominator covers only the real lanes — exact.
        lane_ok = jax.lax.broadcasted_iota(jnp.int32, (1, c_pad), 1) < c_out
        lane_mask = jnp.where(lane_ok, 0.0, -1e30).astype(jnp.float32)

        def softmax_rows(logits):
            logits = logits + lane_mask
            m = jnp.max(logits, axis=-1, keepdims=True)
            p = jnp.exp(logits - m)
            # runs once per call on a tiny table -> exact reciprocal kept (parity gate)
            return p * pl.reciprocal(jnp.sum(p, axis=-1, keepdims=True), approx=False)

        table_ref[pl.ds(0, r2p), :] = softmax_rows(
            jnp.dot(rel_ref[...], in_w_ref[...], preferred_element_type=jnp.float32))
        table_ref[pl.ds(r2p, r2p), :] = softmax_rows(
            jnp.dot(rel_ref[...], out_w_ref[...], preferred_element_type=jnp.float32))

    # -------------------- per edge tile: weighted count scatter -------------------- #
    # dst / norm are lane-major [1, e_tile]: sublane broadcasts are free on the VPU.
    # Padded dummy edges carry norm == 0 -> exact zero contribution.
    a = jnp.where(row_iota_ref[...] == dst_ref[...], norm_ref[...], 0.0)       # [V, Et]
    combo_oh = jnp.where(col_iota_ref[...] == combo_ref[...], 1.0, 0.0)        # [Et, R4]
    # single MXU matmul per tile, contraction over e_tile (multiple of the MXU depth)
    s_ref[...] += jnp.dot(a, combo_oh, preferred_element_type=jnp.float32)

    # ----------------- epilogue (k == last): finalize both outputs ----------------- #
    @pl.when(k == n_tiles - 1)
    def _epilogue():
        agg = jnp.dot(s_ref[...], table_ref[...],
                      preferred_element_type=jnp.float32)                       # [V, Cp]
        loop_term = jnp.dot(x_ref[...], w_loop_ref[...],
                            preferred_element_type=jnp.float32)                 # [V, Cp]
        pre = (agg + loop_term) * (1.0 / 3.0) + bias_ref[...]
        # BatchNorm1d (training): batch statistics, gamma=1, beta=0, eps=1e-5.
        # Padded lanes are exactly zero -> normalize to 0, sliced off in the wrapper.
        mean = jnp.mean(pre, axis=0, keepdims=True)
        var = jnp.mean((pre - mean) ** 2, axis=0, keepdims=True)
        x_out_ref[...] = (pre - mean) * jax.lax.rsqrt(var + 1e-5)
        # fused tiny matmul: rel_out = rel @ w_rel (no second launch)
        rel_out_ref[...] = jnp.dot(rel_ref[...], w_rel_ref[...],
                                   preferred_element_type=jnp.float32)


# -------------------------------- wrapper ----------------------------------- #

def _vmem_budget_bytes():
    """Generation-aware VMEM budget (v7x: 64 MiB/TC, v5e/v6e: 128 MiB)."""
    try:
        info = pltpu.get_tpu_info()
        cap = int(getattr(info, "vmem_capacity_bytes", 0)) or (64 << 20)
    except Exception:
        cap = 64 << 20                      # conservative fallback = v7x per-TC VMEM
    return min((cap * 3) // 4, 100 << 20)   # ~48 MiB on v7x, up to ~100 MiB on v5e/v6e


def _pick_edge_tile(num_edges, num_nodes, r4, vmem_budget):
    """Edge tile: multiple of 256 (>= MXU contraction depth on all generations), grown
    while the per-step working set stays well inside the VMEM budget."""
    def working_set(et):
        onehot_side = 2 * num_nodes * et * 4      # [V, Et] one-hot temp + int32 iota scratch
        combo_side = 2 * et * r4 * 4              # [Et, R4] one-hot temp + int32 iota scratch
        edge_blocks = 2 * 3 * et * 4              # double-buffered dst/combo/norm blocks
        return onehot_side + combo_side + edge_blocks

    et = 256
    cap = max(256, _round_up(num_edges, 256))
    while et * 2 <= min(cap, 4096) and working_set(et * 2) <= vmem_budget // 4:
        et *= 2
    return et


def rel_gcn_cov_forward(x, rel_repr, edge_type, edge_norm, edge_dst, params):
    """Pad/fold parameters and edge metadata, then a single pallas_call."""
    in_w, out_w, loop_w, w_rel, loop_rel, bias = (
        params["in_w"], params["out_w"], params["loop_w"],
        params["w_rel"], params["loop_rel"], params["bias"])

    V, c_in = x.shape
    c_out = in_w.shape[1]
    E = edge_type.shape[0]
    R2 = rel_repr.shape[0]
    assert E % 2 == 0, "first half of the edge list uses in_w, second half out_w"

    vmem_budget = _vmem_budget_bytes()

    c_pad = _round_up(c_out, 128)        # lane-dense outputs / full MXU result lanes
    r2p = _round_up(R2, 8)               # sublane-aligned message-table halves
    r4 = 2 * r2p                         # (type, direction) combo count

    e_tile = _pick_edge_tile(E, V, r4, vmem_budget)
    e_pad = _round_up(E, e_tile)
    n_tiles = e_pad // e_tile

    # ---- parameter glue (parameters only, no per-edge activations) ----
    # ccorr(x, loop_rel) @ loop_w == x @ (circulant(loop_rel) @ loop_w)
    idx = (jnp.arange(c_in)[:, None] + jnp.arange(c_in)[None, :]) % c_in
    w_loop_eff = loop_rel[0][idx].astype(jnp.float32) @ loop_w.astype(jnp.float32)

    def pad_cols(w):
        w = w.astype(jnp.float32)
        return jnp.pad(w, ((0, 0), (0, c_pad - w.shape[-1])))

    in_w_p = pad_cols(in_w)
    out_w_p = pad_cols(out_w)
    w_loop_p = pad_cols(w_loop_eff)
    w_rel_p = pad_cols(w_rel)
    bias_row = pad_cols(bias.reshape(1, c_out))
    rel_p = jnp.pad(rel_repr.astype(jnp.float32), ((0, r2p - R2), (0, 0)))

    # ---- edge metadata: fold direction into a (type, dir) combo index; pad with
    # norm=0 dummy edges so the tile size is decoupled from E (exact, zero contribution).
    dir_idx = (jnp.arange(E) >= (E // 2)).astype(jnp.int32)
    combo = dir_idx * r2p + edge_type.astype(jnp.int32)
    pad = e_pad - E
    combo_col = jnp.pad(combo, (0, pad)).reshape(e_pad, 1)                    # sublane-major
    dst_rows = jnp.pad(edge_dst.astype(jnp.int32), (0, pad)).reshape(n_tiles, 1, e_tile)
    norm_rows = jnp.pad(edge_norm.astype(jnp.float32), (0, pad)).reshape(n_tiles, 1, e_tile)

    kernel = functools.partial(_rel_gcn_kernel, c_out)

    grid_spec = pltpu.PrefetchScalarGridSpec(
        num_scalar_prefetch=0,
        grid=(n_tiles,),
        in_specs=[
            pl.BlockSpec((None, 1, e_tile), lambda k: (k, 0, 0)),   # dst   (lane-major)
            pl.BlockSpec((e_tile, 1), lambda k: (k, 0)),            # combo index
            pl.BlockSpec((None, 1, e_tile), lambda k: (k, 0, 0)),   # norm  (lane-major)
            pl.BlockSpec((r2p, c_in), lambda k: (0, 0)),            # rel table (resident)
            pl.BlockSpec((c_in, c_pad), lambda k: (0, 0)),          # in_w  (lane-padded)
            pl.BlockSpec((c_in, c_pad), lambda k: (0, 0)),          # out_w (lane-padded)
            pl.BlockSpec((V, c_in), lambda k: (0, 0)),              # x (epilogue only)
            pl.BlockSpec((c_in, c_pad), lambda k: (0, 0)),          # circulant @ loop_w
            pl.BlockSpec((1, c_pad), lambda k: (0, 0)),             # bias
            pl.BlockSpec((c_in, c_pad), lambda k: (0, 0)),          # w_rel
        ],
        out_specs=[
            pl.BlockSpec((V, c_pad), lambda k: (0, 0)),             # x_out (lane-dense)
            pl.BlockSpec((r2p, c_pad), lambda k: (0, 0)),           # rel_out
        ],
        scratch_shapes=[
            pltpu.VMEM((V, r4), jnp.float32),       # S: norm-weighted (dst, combo) counts
            pltpu.VMEM((r4, c_pad), jnp.float32),   # softmaxed per-(type,dir) message table
            pltpu.VMEM((V, e_tile), jnp.int32),     # grid-invariant row iota
            pltpu.VMEM((e_tile, r4), jnp.int32),    # grid-invariant col iota
        ],
    )

    x_out_p, rel_out_p = pl.pallas_call(
        kernel,
        out_shape=(jax.ShapeDtypeStruct((V, c_pad), jnp.float32),
                   jax.ShapeDtypeStruct((r2p, c_pad), jnp.float32)),
        grid_spec=grid_spec,
        compiler_params=pltpu.CompilerParams(
            dimension_semantics=("arbitrary",),     # edge axis is a reduction
            vmem_limit_bytes=vmem_budget),
    )(dst_rows, combo_col, norm_rows, rel_p, in_w_p, out_w_p,
      x.astype(jnp.float32), w_loop_p, bias_row, w_rel_p)

    # act is identity (module default); strip lane / row padding
    return x_out_p[:, :c_out], rel_out_p[:R2, :c_out]


# -------------------------- reference (pure JAX) ---------------------------- #

def reference_forward(x, rel_repr, edge_type, edge_norm, edge_dst, params):
    in_w, out_w, loop_w, w_rel, loop_rel, bias = (
        params["in_w"], params["out_w"], params["loop_w"],
        params["w_rel"], params["loop_rel"], params["bias"])
    V, c_in = x.shape
    E = edge_type.shape[0]

    edge_rel = rel_repr[edge_type]
    msg = jnp.concatenate([edge_rel[: E // 2] @ in_w, edge_rel[E // 2:] @ out_w], axis=0)
    msg = jax.nn.softmax(msg, axis=1)
    msg = msg * edge_norm[:, None]
    agg = jnp.zeros((V, in_w.shape[1]), jnp.float32).at[edge_dst].add(msg) / 3.0

    fa = jnp.fft.rfft(x, axis=-1)
    fb = jnp.fft.rfft(jnp.broadcast_to(loop_rel, x.shape), axis=-1)
    cc = jnp.fft.irfft(jnp.conj(fa) * fb, n=c_in, axis=-1).astype(jnp.float32)

    pre = agg + (cc @ loop_w) / 3.0 + bias[None, :]
    mean = jnp.mean(pre, axis=0, keepdims=True)
    var = jnp.mean((pre - mean) ** 2, axis=0, keepdims=True)
    x_out = (pre - mean) * jax.lax.rsqrt(var + 1e-5)
    return x_out, rel_repr @ w_rel


# ---------------------------------- main ------------------------------------ #

def xavier_normal(key, shape, gain):
    fan_in, fan_out = shape[0], shape[1]
    std = gain * jnp.sqrt(2.0 / (fan_in + fan_out))
    return (jax.random.normal(key, shape, jnp.float32) * std).astype(jnp.float32)


if __name__ == "__main__":
    in_channels, out_channels = 16, 32
    num_rel = 4
    V, E = 16, 32                                  # E even: first half in_w, second half out_w
    gain = jnp.sqrt(2.0)                           # nn.init.calculate_gain('relu')

    key = jax.random.PRNGKey(0)
    keys = jax.random.split(key, 10)

    params = {
        "in_w":     xavier_normal(keys[0], (in_channels, out_channels), gain),
        "out_w":    xavier_normal(keys[1], (in_channels, out_channels), gain),
        "loop_w":   xavier_normal(keys[2], (in_channels, out_channels), gain),
        "w_rel":    xavier_normal(keys[3], (in_channels, out_channels), gain),
        "loop_rel": xavier_normal(keys[4], (1, in_channels), gain),
        "bias":     jnp.zeros((out_channels,), jnp.float32),
    }

    x = jax.random.normal(keys[5], (V, in_channels), jnp.float32)
    rel_repr = jax.random.normal(keys[6], (num_rel * 2, in_channels), jnp.float32)
    edge_type = jax.random.randint(keys[7], (E,), 0, num_rel * 2, jnp.int32)
    edge_norm = jax.random.uniform(keys[8], (E,), jnp.float32, 0.1, 1.0)
    edge_dst = jax.random.randint(keys[9], (E,), 0, V, jnp.int32)

    x_out, rel_out = rel_gcn_cov_forward(x, rel_repr, edge_type, edge_norm, edge_dst, params)
    jax.block_until_ready((x_out, rel_out))

    x_ref, rel_ref = reference_forward(x, rel_repr, edge_type, edge_norm, edge_dst, params)
    assert jnp.allclose(x_out, x_ref, rtol=1e-4, atol=1e-4)
    assert jnp.allclose(rel_out, rel_ref, rtol=1e-4, atol=1e-4)

    print("KERNEL_OK")
</pallas_src>

<mosaic_0001>
module attributes {stable_mosaic.version = 11 : i64} {
  func.func @_rel_gcn_kernel(%arg0: i32, %arg1: memref<1x1x256xi32, #tpu.memory_space<vmem>>, %arg2: memref<256x1xi32, #tpu.memory_space<vmem>>, %arg3: memref<1x1x256xf32, #tpu.memory_space<vmem>>, %arg4: memref<8x16xf32, #tpu.memory_space<vmem>>, %arg5: memref<16x128xf32, #tpu.memory_space<vmem>>, %arg6: memref<16x128xf32, #tpu.memory_space<vmem>>, %arg7: memref<16x16xf32, #tpu.memory_space<vmem>>, %arg8: memref<16x128xf32, #tpu.memory_space<vmem>>, %arg9: memref<1x128xf32, #tpu.memory_space<vmem>>, %arg10: memref<16x128xf32, #tpu.memory_space<vmem>>, %arg11: memref<16x128xf32, #tpu.memory_space<vmem>>, %arg12: memref<8x128xf32, #tpu.memory_space<vmem>>, %arg13: memref<16x16xf32, #tpu.memory_space<vmem>>, %arg14: memref<16x128xf32, #tpu.memory_space<vmem>>, %arg15: memref<16x256xi32, #tpu.memory_space<vmem>>, %arg16: memref<256x16xi32, #tpu.memory_space<vmem>>) attributes {dimension_semantics = [#tpu.dimension_semantics<arbitrary>], iteration_bounds = array<i64: 1>, scalar_prefetch = 0 : i64, scratch_operands = 4 : i64, tpu.core_type = #tpu.core_type<tc>, window_params = [{transform_indices = @transform_0, window_bounds = array<i64: 1, 1, 256>}, {transform_indices = @transform_1, window_bounds = array<i64: 256, 1>}, {transform_indices = @transform_2, window_bounds = array<i64: 1, 1, 256>}, {pipeline_mode = #tpu.pipeline_mode<synchronous>, transform_indices = @transform_3, window_bounds = array<i64: 8, 16>}, {pipeline_mode = #tpu.pipeline_mode<synchronous>, transform_indices = @transform_4, window_bounds = array<i64: 16, 128>}, {pipeline_mode = #tpu.pipeline_mode<synchronous>, transform_indices = @transform_5, window_bounds = array<i64: 16, 128>}, {pipeline_mode = #tpu.pipeline_mode<synchronous>, transform_indices = @transform_6, window_bounds = array<i64: 16, 16>}, {pipeline_mode = #tpu.pipeline_mode<synchronous>, transform_indices = @transform_7, window_bounds = array<i64: 16, 128>}, {pipeline_mode = #tpu.pipeline_mode<synchronous>, transform_indices = @transform_8, window_bounds = array<i64: 1, 128>}, {pipeline_mode = #tpu.pipeline_mode<synchronous>, transform_indices = @transform_9, window_bounds = array<i64: 16, 128>}, {pipeline_mode = #tpu.pipeline_mode<synchronous>, transform_indices = @transform_10, window_bounds = array<i64: 16, 128>}, {pipeline_mode = #tpu.pipeline_mode<synchronous>, transform_indices = @transform_11, window_bounds = array<i64: 8, 128>}]} {
    %c0_i32 = arith.constant 0 : i32
    %0 = arith.cmpi eq, %arg0, %c0_i32 : i32
    %1 = arith.extui %0 : i1 to i32
    %c0_i32_0 = arith.constant 0 : i32
    %2 = arith.cmpi ne, %1, %c0_i32_0 : i32
    scf.if %2 {
      %cst_21 = arith.constant 0.000000e+00 : f32
      %28 = vector.broadcast %cst_21 : f32 to vector<16x16xf32>
      %c0_22 = arith.constant 0 : index
      %c0_23 = arith.constant 0 : index
      %29 = vector.load %arg13[%c0_22, %c0_23] : memref<16x16xf32, #tpu.memory_space<vmem>>, vector<16x16xf32>
      tpu.vector_store %arg13[%c0_22, %c0_23], %28 {strides = array<i32>} : memref<16x16xf32, #tpu.memory_space<vmem>>, vector<16x16xf32>,
      %30 = tpu.iota {dimensions = array<i32: 0>} : vector<16x256xi32>
      %c0_24 = arith.constant 0 : index
      %c0_25 = arith.constant 0 : index
      %31 = vector.load %arg15[%c0_24, %c0_25] : memref<16x256xi32, #tpu.memory_space<vmem>>, vector<16x256xi32>
      tpu.vector_store %arg15[%c0_24, %c0_25], %30 {strides = array<i32>} : memref<16x256xi32, #tpu.memory_space<vmem>>, vector<16x256xi32>,
      %32 = tpu.iota {dimensions = array<i32: 1>} : vector<256x16xi32>
      %c0_26 = arith.constant 0 : index
      %c0_27 = arith.constant 0 : index
      %33 = vector.load %arg16[%c0_26, %c0_27] : memref<256x16xi32, #tpu.memory_space<vmem>>, vector<256x16xi32>
      tpu.vector_store %arg16[%c0_26, %c0_27], %32 {strides = array<i32>} : memref<256x16xi32, #tpu.memory_space<vmem>>, vector<256x16xi32>,
      %34 = tpu.iota {dimensions = array<i32: 1>} : vector<1x128xi32>
      %c32_i32 = arith.constant 32 : i32
      %35 = vector.broadcast %c32_i32 : i32 to vector<1x128xi32>
      %36 = arith.cmpi slt, %34, %35 : vector<1x128xi32>
      %cst_28 = arith.constant 0.000000e+00 : f32
      %cst_29 = arith.constant -1.000000e+30 : f32
      %37 = vector.broadcast %cst_28 : f32 to vector<1x128xf32>
      %38 = vector.broadcast %cst_29 : f32 to vector<1x128xf32>
      %39 = arith.select %36, %37, %38 : vector<1x128xi1>, vector<1x128xf32>
      %c0_30 = arith.constant 0 : index
      %c0_31 = arith.constant 0 : index
      %40 = vector.load %arg4[%c0_30, %c0_31] : memref<8x16xf32, #tpu.memory_space<vmem>>, vector<8x16xf32>
      %c0_32 = arith.constant 0 : index
      %c0_33 = arith.constant 0 : index
      %41 = vector.load %arg5[%c0_32, %c0_33] : memref<16x128xf32, #tpu.memory_space<vmem>>, vector<16x128xf32>
      %cst_34 = arith.constant dense<0.000000e+00> : vector<8x128xf32>
      %42 = tpu.matmul %40, %41, %cst_34 {dimension_numbers = #tpu.dot_dimension_numbers<[1], [0], [0], [1], [0, 0, 1, 1], [], []>} : vector<8x16xf32>, vector<16x128xf32>, vector<8x128xf32> -> vector<8x128xf32>
      %43 = vector.broadcast %39 : vector<1x128xf32> to vector<8x128xf32>
      %44 = arith.addf %42, %43 : vector<8x128xf32>
      %cst_35 = arith.constant dense<0xFF800000> : vector<8xf32>
      %45 = vector.multi_reduction <maximumf>, %44, %cst_35 [1] : vector<8x128xf32> to vector<8xf32>
      %46 = vector.shape_cast %45 : vector<8xf32> to vector<8x1xf32>
      %47 = vector.broadcast %46 : vector<8x1xf32> to vector<8x128xf32>
      %48 = arith.subf %44, %47 : vector<8x128xf32>
      %49 = math.exp %48 : vector<8x128xf32>
      %cst_36 = arith.constant dense<0.000000e+00> : vector<8xf32>
      %50 = vector.multi_reduction <add>, %49, %cst_36 [1] : vector<8x128xf32> to vector<8xf32>
      %51 = vector.shape_cast %50 : vector<8xf32> to vector<8x1xf32>
      %52 = tpu.reciprocal %51 : vector<8x1xf32> -> vector<8x1xf32>
      %53 = vector.broadcast %52 : vector<8x1xf32> to vector<8x128xf32>
      %54 = arith.mulf %49, %53 : vector<8x128xf32>
      %c0_37 = arith.constant 0 : index
      %c0_38 = arith.constant 0 : index
      %55 = vector.load %arg14[%c0_37, %c0_38] : memref<16x128xf32, #tpu.memory_space<vmem>>, vector<8x128xf32>
      tpu.vector_store %arg14[%c0_37, %c0_38], %54 {strides = array<i32>} : memref<16x128xf32, #tpu.memory_space<vmem>>, vector<8x128xf32>,
      %c0_39 = arith.constant 0 : index
      %c0_40 = arith.constant 0 : index
      %56 = vector.load %arg4[%c0_39, %c0_40] : memref<8x16xf32, #tpu.memory_space<vmem>>, vector<8x16xf32>
      %c0_41 = arith.constant 0 : index
      %c0_42 = arith.constant 0 : index
      %57 = vector.load %arg6[%c0_41, %c0_42] : memref<16x128xf32, #tpu.memory_space<vmem>>, vector<16x128xf32>
      %cst_43 = arith.constant dense<0.000000e+00> : vector<8x128xf32>
      %58 = tpu.matmul %56, %57, %cst_43 {dimension_numbers = #tpu.dot_dimension_numbers<[1], [0], [0], [1], [0, 0, 1, 1], [], []>} : vector<8x16xf32>, vector<16x128xf32>, vector<8x128xf32> -> vector<8x128xf32>
      %59 = vector.broadcast %39 : vector<1x128xf32> to vector<8x128xf32>
      %60 = arith.addf %58, %59 : vector<8x128xf32>
      %cst_44 = arith.constant dense<0xFF800000> : vector<8xf32>
      %61 = vector.multi_reduction <maximumf>, %60, %cst_44 [1] : vector<8x128xf32> to vector<8xf32>
      %62 = vector.shape_cast %61 : vector<8xf32> to vector<8x1xf32>
      %63 = vector.broadcast %62 : vector<8x1xf32> to vector<8x128xf32>
      %64 = arith.subf %60, %63 : vector<8x128xf32>
      %65 = math.exp %64 : vector<8x128xf32>
      %cst_45 = arith.constant dense<0.000000e+00> : vector<8xf32>
      %66 = vector.multi_reduction <add>, %65, %cst_45 [1] : vector<8x128xf32> to vector<8xf32>
      %67 = vector.shape_cast %66 : vector<8xf32> to vector<8x1xf32>
      %68 = tpu.reciprocal %67 : vector<8x1xf32> -> vector<8x1xf32>
      %69 = vector.broadcast %68 : vector<8x1xf32> to vector<8x128xf32>
      %70 = arith.mulf %65, %69 : vector<8x128xf32>
      %c8 = arith.constant 8 : index
      %c0_46 = arith.constant 0 : index
      %71 = vector.load %arg14[%c8, %c0_46] : memref<16x128xf32, #tpu.memory_space<vmem>>, vector<8x128xf32>
      tpu.vector_store %arg14[%c8, %c0_46], %70 {strides = array<i32>} : memref<16x128xf32, #tpu.memory_space<vmem>>, vector<8x128xf32>,
    } else {
    }
    %c0 = arith.constant 0 : index
    %c0_1 = arith.constant 0 : index
    %3 = vector.load %arg15[%c0, %c0_1] : memref<16x256xi32, #tpu.memory_space<vmem>>, vector<16x256xi32>
    %c0_2 = arith.constant 0 : index
    %c0_3 = arith.constant 0 : index
    %c0_4 = arith.constant 0 : index
    %4 = vector.load %arg1[%c0_2, %c0_3, %c0_4] : memref<1x1x256xi32, #tpu.memory_space<vmem>>, vector<1x1x256xi32>
    %5 = vector.shape_cast %4 : vector<1x1x256xi32> to vector<1x256xi32>
    %6 = vector.broadcast %5 : vector<1x256xi32> to vector<16x256xi32>
    %7 = arith.cmpi eq, %3, %6 : vector<16x256xi32>
    %c0_5 = arith.constant 0 : index
    %c0_6 = arith.constant 0 : index
    %c0_7 = arith.constant 0 : index
    %8 = vector.load %arg3[%c0_5, %c0_6, %c0_7] : memref<1x1x256xf32, #tpu.memory_space<vmem>>, vector<1x1x256xf32>
    %9 = vector.shape_cast %8 : vector<1x1x256xf32> to vector<1x256xf32>
    %cst = arith.constant 0.000000e+00 : f32
    %10 = vector.shape_cast %9 : vector<1x256xf32> to vector<1x256xf32>
    %11 = vector.broadcast %10 : vector<1x256xf32> to vector<16x256xf32>
    %12 = vector.broadcast %cst : f32 to vector<16x256xf32>
    %13 = arith.select %7, %11, %12 : vector<16x256xi1>, vector<16x256xf32>
    %c0_8 = arith.constant 0 : index
    %c0_9 = arith.constant 0 : index
    %14 = vector.load %arg16[%c0_8, %c0_9] : memref<256x16xi32, #tpu.memory_space<vmem>>, vector<256x16xi32>
    %c0_10 = arith.constant 0 : index
    %c0_11 = arith.constant 0 : index
    %15 = vector.load %arg2[%c0_10, %c0_11] : memref<256x1xi32, #tpu.memory_space<vmem>>, vector<256x1xi32>
    %16 = vector.broadcast %15 : vector<256x1xi32> to vector<256x16xi32>
    %17 = arith.cmpi eq, %14, %16 : vector<256x16xi32>
    %cst_12 = arith.constant 1.000000e+00 : f32
    %cst_13 = arith.constant 0.000000e+00 : f32
    %18 = vector.broadcast %cst_12 : f32 to vector<256x16xf32>
    %19 = vector.broadcast %cst_13 : f32 to vector<256x16xf32>
    %20 = arith.select %17, %18, %19 : vector<256x16xi1>, vector<256x16xf32>
    %c0_14 = arith.constant 0 : index
    %c0_15 = arith.constant 0 : index
    %21 = vector.load %arg13[%c0_14, %c0_15] : memref<16x16xf32, #tpu.memory_space<vmem>>, vector<16x16xf32>
    %cst_16 = arith.constant dense<0.000000e+00> : vector<16x16xf32>
    %22 = tpu.matmul %13, %20, %cst_16 {dimension_numbers = #tpu.dot_dimension_numbers<[1], [0], [0], [1], [0, 0, 1, 1], [], []>} : vector<16x256xf32>, vector<256x16xf32>, vector<16x16xf32> -> vector<16x16xf32>
    %23 = arith.addf %21, %22 : vector<16x16xf32>
    %c0_17 = arith.constant 0 : index
    %c0_18 = arith.constant 0 : index
    %24 = vector.load %arg13[%c0_17, %c0_18] : memref<16x16xf32, #tpu.memory_space<vmem>>, vector<16x16xf32>
    tpu.vector_store %arg13[%c0_17, %c0_18], %23 {strides = array<i32>} : memref<16x16xf32, #tpu.memory_space<vmem>>, vector<16x16xf32>,
    %c0_i32_19 = arith.constant 0 : i32
    %25 = arith.cmpi eq, %arg0, %c0_i32_19 : i32
    %26 = arith.extui %25 : i1 to i32
    %c0_i32_20 = arith.constant 0 : i32
    %27 = arith.cmpi ne, %26, %c0_i32_20 : i32
    scf.if %27 {
      %c0_21 = arith.constant 0 : index
      %c0_22 = arith.constant 0 : index
      %28 = vector.load %arg13[%c0_21, %c0_22] : memref<16x16xf32, #tpu.memory_space<vmem>>, vector<16x16xf32>
      %c0_23 = arith.constant 0 : index
      %c0_24 = arith.constant 0 : index
      %29 = vector.load %arg14[%c0_23, %c0_24] : memref<16x128xf32, #tpu.memory_space<vmem>>, vector<16x128xf32>
      %cst_25 = arith.constant dense<0.000000e+00> : vector<16x128xf32>
      %30 = tpu.matmul %28, %29, %cst_25 {dimension_numbers = #tpu.dot_dimension_numbers<[1], [0], [0], [1], [0, 0, 1, 1], [], []>} : vector<16x16xf32>, vector<16x128xf32>, vector<16x128xf32> -> vector<16x128xf32>
      %c0_26 = arith.constant 0 : index
      %c0_27 = arith.constant 0 : index
      %31 = vector.load %arg7[%c0_26, %c0_27] : memref<16x16xf32, #tpu.memory_space<vmem>>, vector<16x16xf32>
      %c0_28 = arith.constant 0 : index
      %c0_29 = arith.constant 0 : index
      %32 = vector.load %arg8[%c0_28, %c0_29] : memref<16x128xf32, #tpu.memory_space<vmem>>, vector<16x128xf32>
      %cst_30 = arith.constant dense<0.000000e+00> : vector<16x128xf32>
      %33 = tpu.matmul %31, %32, %cst_30 {dimension_numbers = #tpu.dot_dimension_numbers<[1], [0], [0], [1], [0, 0, 1, 1], [], []>} : vector<16x16xf32>, vector<16x128xf32>, vector<16x128xf32> -> vector<16x128xf32>
      %34 = arith.addf %30, %33 : vector<16x128xf32>
      %cst_31 = arith.constant 0.333333343 : f32
      %35 = vector.broadcast %cst_31 : f32 to vector<16x128xf32>
      %36 = arith.mulf %34, %35 : vector<16x128xf32>
      %c0_32 = arith.constant 0 : index
      %c0_33 = arith.constant 0 : index
      %37 = vector.load %arg9[%c0_32, %c0_33] : memref<1x128xf32, #tpu.memory_space<vmem>>, vector<1x128xf32>
      %38 = vector.broadcast %37 : vector<1x128xf32> to vector<16x128xf32>
      %39 = arith.addf %36, %38 : vector<16x128xf32>
      %cst_34 = arith.constant dense<0.000000e+00> : vector<128xf32>
      %40 = vector.multi_reduction <add>, %39, %cst_34 [0] : vector<16x128xf32> to vector<128xf32>
      %41 = vector.shape_cast %40 : vector<128xf32> to vector<1x128xf32>
      %cst_35 = arith.constant 1.600000e+01 : f32
      %42 = vector.broadcast %cst_35 : f32 to vector<1x128xf32>
      %43 = arith.divf %41, %42 : vector<1x128xf32>
      %44 = vector.broadcast %43 : vector<1x128xf32> to vector<16x128xf32>
      %45 = arith.subf %39, %44 : vector<16x128xf32>
      %46 = arith.mulf %45, %45 : vector<16x128xf32>
      %cst_36 = arith.constant dense<0.000000e+00> : vector<128xf32>
      %47 = vector.multi_reduction <add>, %46, %cst_36 [0] : vector<16x128xf32> to vector<128xf32>
      %48 = vector.shape_cast %47 : vector<128xf32> to vector<1x128xf32>
      %cst_37 = arith.constant 1.600000e+01 : f32
      %49 = vector.broadcast %cst_37 : f32 to vector<1x128xf32>
      %50 = arith.divf %48, %49 : vector<1x128xf32>
      %51 = vector.broadcast %43 : vector<1x128xf32> to vector<16x128xf32>
      %52 = arith.subf %39, %51 : vector<16x128xf32>
      %cst_38 = arith.constant 9.99999974E-6 : f32
      %53 = vector.broadcast %cst_38 : f32 to vector<1x128xf32>
      %54 = arith.addf %50, %53 : vector<1x128xf32>
      %55 = math.rsqrt %54 : vector<1x128xf32>
      %56 = vector.broadcast %55 : vector<1x128xf32> to vector<16x128xf32>
      %57 = arith.mulf %52, %56 : vector<16x128xf32>
      %c0_39 = arith.constant 0 : index
      %c0_40 = arith.constant 0 : index
      %58 = vector.load %arg11[%c0_39, %c0_40] : memref<16x128xf32, #tpu.memory_space<vmem>>, vector<16x128xf32>
      tpu.vector_store %arg11[%c0_39, %c0_40], %57 {strides = array<i32>} : memref<16x128xf32, #tpu.memory_space<vmem>>, vector<16x128xf32>,
      %c0_41 = arith.constant 0 : index
      %c0_42 = arith.constant 0 : index
      %59 = vector.load %arg4[%c0_41, %c0_42] : memref<8x16xf32, #tpu.memory_space<vmem>>, vector<8x16xf32>
      %c0_43 = arith.constant 0 : index
      %c0_44 = arith.constant 0 : index
      %60 = vector.load %arg10[%c0_43, %c0_44] : memref<16x128xf32, #tpu.memory_space<vmem>>, vector<16x128xf32>
      %cst_45 = arith.constant dense<0.000000e+00> : vector<8x128xf32>
      %61 = tpu.matmul %59, %60, %cst_45 {dimension_numbers = #tpu.dot_dimension_numbers<[1], [0], [0], [1], [0, 0, 1, 1], [], []>} : vector<8x16xf32>, vector<16x128xf32>, vector<8x128xf32> -> vector<8x128xf32>
      %c0_46 = arith.constant 0 : index
      %c0_47 = arith.constant 0 : index
      %62 = vector.load %arg12[%c0_46, %c0_47] : memref<8x128xf32, #tpu.memory_space<vmem>>, vector<8x128xf32>
      tpu.vector_store %arg12[%c0_46, %c0_47], %61 {strides = array<i32>} : memref<8x128xf32, #tpu.memory_space<vmem>>, vector<8x128xf32>,
    } else {
    }
    return
  }
  func.func @transform_0(%arg0: i32) -> (i32, i32, i32) {
    %c0_i32 = arith.constant 0 : i32
    %c0_i32_0 = arith.constant 0 : i32
    %c0_i32_1 = arith.constant 0 : i32
    return %arg0, %c0_i32, %c0_i32_0 : i32, i32, i32
  }
  func.func @transform_1(%arg0: i32) -> (i32, i32) {
    %c0_i32 = arith.constant 0 : i32
    %c0_i32_0 = arith.constant 0 : i32
    return %arg0, %c0_i32 : i32, i32
  }
  func.func @transform_2(%arg0: i32) -> (i32, i32, i32) {
    %c0_i32 = arith.constant 0 : i32
    %c0_i32_0 = arith.constant 0 : i32
    %c0_i32_1 = arith.constant 0 : i32
    return %arg0, %c0_i32, %c0_i32_0 : i32, i32, i32
  }
  func.func @transform_3(%arg0: i32) -> (i32, i32) {
    %c0_i32 = arith.constant 0 : i32
    %c0_i32_0 = arith.constant 0 : i32
    %c0_i32_1 = arith.constant 0 : i32
    return %c0_i32, %c0_i32_0 : i32, i32
  }
  func.func @transform_4(%arg0: i32) -> (i32, i32) {
    %c0_i32 = arith.constant 0 : i32
    %c0_i32_0 = arith.constant 0 : i32
    %c0_i32_1 = arith.constant 0 : i32
    return %c0_i32, %c0_i32_0 : i32, i32
  }
  func.func @transform_5(%arg0: i32) -> (i32, i32) {
    %c0_i32 = arith.constant 0 : i32
    %c0_i32_0 = arith.constant 0 : i32
    %c0_i32_1 = arith.constant 0 : i32
    return %c0_i32, %c0_i32_0 : i32, i32
  }
  func.func @transform_6(%arg0: i32) -> (i32, i32) {
    %c0_i32 = arith.constant 0 : i32
    %c0_i32_0 = arith.constant 0 : i32
    %c0_i32_1 = arith.constant 0 : i32
    return %c0_i32, %c0_i32_0 : i32, i32
  }
  func.func @transform_7(%arg0: i32) -> (i32, i32) {
    %c0_i32 = arith.constant 0 : i32
    %c0_i32_0 = arith.constant 0 : i32
    %c0_i32_1 = arith.constant 0 : i32
    return %c0_i32, %c0_i32_0 : i32, i32
  }
  func.func @transform_8(%arg0: i32) -> (i32, i32) {
    %c0_i32 = arith.constant 0 : i32
    %c0_i32_0 = arith.constant 0 : i32
    %c0_i32_1 = arith.constant 0 : i32
    return %c0_i32, %c0_i32_0 : i32, i32
  }
  func.func @transform_9(%arg0: i32) -> (i32, i32) {
    %c0_i32 = arith.constant 0 : i32
    %c0_i32_0 = arith.constant 0 : i32
    %c0_i32_1 = arith.constant 0 : i32
    return %c0_i32, %c0_i32_0 : i32, i32
  }
  func.func @transform_10(%arg0: i32) -> (i32, i32) {
    %c0_i32 = arith.constant 0 : i32
    %c0_i32_0 = arith.constant 0 : i32
    %c0_i32_1 = arith.constant 0 : i32
    return %c0_i32, %c0_i32_0 : i32, i32
  }
  func.func @transform_11(%arg0: i32) -> (i32, i32) {
    %c0_i32 = arith.constant 0 : i32
    %c0_i32_0 = arith.constant 0 : i32
    %c0_i32_1 = arith.constant 0 : i32
    return %c0_i32, %c0_i32_0 : i32, i32
  }
}

</mosaic_0001>

<bundles_post_ra>
// kernel: tpu_custom_call.1
= control target key start
LH: loop header
LB: loop body
LE: loop exit
PB: predicated region body
PF: predicated region fallthrough
CT: control target
= control target key end

     0   :  { %17 = vsyncpa [#allocation7], 0  ;;  %v785_v3 = vmov 0   ;;  %vm43_vm0 = vcmask 130048   ;;  %s1131_s0 = inlined_call_operand.vmem [shape: s32[1,1,256], index: 0, kind: input, shape index: {}]   ;;  %s1132_s1 = inlined_call_operand.vmem [shape: s32[256,1], index: 1, kind: input, shape index: {}]   ;;  %s1133_s2 = inlined_call_operand.vmem [shape: f32[1,1,256], index: 2, kind: input, shape index: {}]   ;;  %s1134_s3 = inlined_call_operand.vmem [shape: f32[8,16], index: 3, kind: input, shape index: {}]   ;;  %s1135_s4 = inlined_call_operand.vmem [shape: f32[16,128], index: 4, kind: input, shape index: {}]   ;;  %s1136_s5 = inlined_call_operand.vmem [shape: f32[16,128], index: 5, kind: input, shape index: {}]   ;;  %s1137_s6 = inlined_call_operand.vmem [shape: f32[16,16], index: 6, kind: input, shape index: {}]   ;;  %s1138_s7 = inlined_call_operand.vmem [shape: f32[16,128], index: 7, kind: input, shape index: {}]   ;;  %s1139_s8 = inlined_call_operand.vmem [shape: f32[1,128], index: 8, kind: input, shape index: {}]   ;;  %s1140_s9 = inlined_call_operand.vmem [shape: f32[16,128], index: 9, kind: input, shape index: {}]   ;;  %s1141_s10 = inlined_call_operand.hbm [shape: f32[16,128], index: 10, kind: output, shape index: {0}]   ;;  %s1142_s11 = inlined_call_operand.hbm [shape: f32[8,128], index: 11, kind: output, shape index: {1}]  }
   0x1   :  { %v91_v0 = vld [vmem:[%s1135_s4 + $0x8] sm:$0xff]  ;;  %v255_v2 = vld [vmem:[%s1132_s1 + $0x78] sm:$0xff]  ;;  %719 = vset.pattern.permute.xlu2 %v785_v3  ;;  %718 = vset.pattern.permute.xlu1 %v785_v3  ;;  %v254_v4 = vld [vmem:[%s1132_s1 + $0x70] sm:$0xff] }
   0x2   :  { %v140_v1 = vld [vmem:[%s1136_s5 + $0x8] sm:$0xff]  ;;  %717 = vset.pattern.permute.xlu0 %v785_v3  ;;  %109 = vmatpush.msra.mxu0 %v91_v0  ;;  %v90_v6 = vld [vmem:[%s1135_s4] sm:$0xff] }
   0x3   :  { %v253_v5 = vld [vmem:[%s1132_s1 + $0x68] sm:$0xff]  ;;  %v139_v7 = vld [vmem:[%s1136_s5] sm:$0xff]  ;;  %158 = vmatpush.msra.mxu1 %v140_v1  ;;  %318 = vperm.xlu0 %717, %v255_v2  }
   0x4   :  { %v878_v8 = vld [vmem:[%s1134_s3] sm:$0xff]  ;;  %315 = vperm.xlu1 %718, %v254_v4   ;;  %312 = vperm.xlu2 %719, %v253_v5  }
   0x5   :  { %110 = vmatpush.msra.mxu0 %v90_v6  ;;  %159 = vmatpush.msra.mxu1 %v139_v7 }
   0x6   :  { %665 = vmatmul.msk.f32.vlgmr.msra.gmra.mxu0 %vm43_vm0, %v878_v8  ;;  %666 = vmatmul.msk.f32.vlgmr.msra.gmra.mxu1 %vm43_vm0, %v878_v8 }
   0x7   :  { %18 = vsyncpa [#allocation9], 0  ;;  %v271_v9 = vld [vmem:[%s1132_s1 + $0xf8] sm:$0xff]  ;;  %v270_v10 = vld [vmem:[%s1132_s1 + $0xf0] sm:$0xff]  ;;  %v46_v30 = vlaneseq  ;;  %v786_v48 = vmov 1.0   ;;  %s651_s18 = sshll.u32 %s1142_s11, 4  ;;  %s652_s18 = int_to_ptr.hbm [resolvable:$true] %s651_s18 }
   0x8   :  { %v269_v11 = vld [vmem:[%s1132_s1 + $0xe8] sm:$0xff]  ;;  %v252_v12 = vld [vmem:[%s1132_s1 + $0x60] sm:$0xff]  ;;  %v251_v14 = vld [vmem:[%s1132_s1 + $0x58] sm:$0xff]  ;;  %v787_v55 = vmov -1e+30   ;;  %s791_s11 = smov [#allocation6]  }
   0x9   :  { %v268_v13 = vld [vmem:[%s1132_s1 + $0xe0] sm:$0xff]  ;;  %v267_v15 = vld [vmem:[%s1132_s1 + $0xd8] sm:$0xff]  ;;  %v266_v16 = vld [vmem:[%s1132_s1 + $0xd0] sm:$0xff]  ;;  %v951_v32 = vand.u32 127, %v46_v30  ;;  %s635_s19 = sshll.u32 %s791_s11, 4  ;;  %s637_s22 = sshll.u32 %s1141_s10, 4  ;;  %s636_s19 = int_to_ptr.vmem [resolvable:$true] %s635_s19  ;;  %s638_s22 = int_to_ptr.hbm [resolvable:$true] %s637_s22 }
   0xa   :  { %v250_v17 = vld [vmem:[%s1132_s1 + $0x50] sm:$0xff]  ;;  %v249_v18 = vld [vmem:[%s1132_s1 + $0x48] sm:$0xff]  ;;  %v248_v20 = vld [vmem:[%s1132_s1 + $0x40] sm:$0xff]  ;;  %s792_s23 = smov 128   ;;  %s793_s24 = smov 8  }
   0xb   :  { %366 = vperm.xlu0 %717, %v271_v9   ;;  %v265_v19 = vld [vmem:[%s1132_s1 + $0xc8] sm:$0xff]  ;;  %v264_v21 = vld [vmem:[%s1132_s1 + $0xc0] sm:$0xff]  ;;  %v263_v22 = vld [vmem:[%s1132_s1 + $0xb8] sm:$0xff]  ;;  %68 = vst.msk [vmem:[#allocation5 + $0x68] sm:$0xff] %vm43_vm0, %v951_v32  ;;  %vm87_vm5 = vcmp.lt.s32.totalorder %v951_v32, 32 }
   0xc   :  { %363 = vperm.xlu1 %718, %v270_v10   ;;  %360 = vperm.xlu2 %719, %v269_v11   ;;  %v247_v23 = vld [vmem:[%s1132_s1 + $0x38] sm:$0xff]  ;;  %v246_v24 = vld [vmem:[%s1132_s1 + $0x30] sm:$0xff]  ;;  %v245_v26 = vld [vmem:[%s1132_s1 + $0x28] sm:$0xff]  ;;  %55 = vst.msk [vmem:[#allocation5] sm:$0xff] %vm43_vm0, %v951_v32  ;;  %v88_v56 = vsel %vm87_vm5, 0.0, %v787_v55 }
   0xd   :  { %v262_v25 = vld [vmem:[%s1132_s1 + $0xb0] sm:$0xff]  ;;  %v261_v27 = vld [vmem:[%s1132_s1 + $0xa8] sm:$0xff]  ;;  %v260_v28 = vld [vmem:[%s1132_s1 + $0xa0] sm:$0xff]  ;;  %56 = vst.msk [vmem:[#allocation5 + $0x8] sm:$0xff] %vm43_vm0, %v951_v32 }
   0xe   :  { %v244_v29 = vld [vmem:[%s1132_s1 + $0x20] sm:$0xff]  ;;  %v243_v31 = vld [vmem:[%s1132_s1 + $0x18] sm:$0xff]  ;;  %v242_v34 = vld [vmem:[%s1132_s1 + $0x10] sm:$0xff]  ;;  %57 = vst.msk [vmem:[#allocation5 + $0x10] sm:$0xff] %vm43_vm0, %v951_v32 }
   0xf   :  { %v259_v33 = vld [vmem:[%s1132_s1 + $0x98] sm:$0xff]  ;;  %58 = vst.msk [vmem:[#allocation5 + $0x18] sm:$0xff] %vm43_vm0, %v951_v32  ;;  %v258_v35 = vld [vmem:[%s1132_s1 + $0x90] sm:$0xff]  ;;  %v257_v36 = vld [vmem:[%s1132_s1 + $0x88] sm:$0xff] }
  0x10   :  { %59 = vst.msk [vmem:[#allocation5 + $0x20] sm:$0xff] %vm43_vm0, %v951_v32  ;;  %v241_v37 = vld [vmem:[%s1132_s1 + $0x8] sm:$0xff]  ;;  %v240_v38 = vld [vmem:[%s1132_s1] sm:$0xff] }
  0x11   :  { %60 = vst.msk [vmem:[#allocation5 + $0x28] sm:$0xff] %vm43_vm0, %v951_v32  ;;  %v256_v39 = vld [vmem:[%s1132_s1 + $0x80] sm:$0xff] }
  0x12   :  { %61 = vst.msk [vmem:[#allocation5 + $0x30] sm:$0xff] %vm43_vm0, %v951_v32  ;;  %v221_v46 = vld [vmem:[#allocation5 + $0x68] sm:$0xff] }
  0x13   :  { %309 = vperm.xlu0 %717, %v252_v12   ;;  %62 = vst.msk [vmem:[#allocation5 + $0x38] sm:$0xff] %vm43_vm0, %v951_v32 }
  0x14   :  { %357 = vperm.xlu1 %718, %v268_v13   ;;  %306 = vperm.xlu2 %719, %v251_v14   ;;  %63 = vst.msk [vmem:[#allocation5 + $0x40] sm:$0xff] %vm43_vm0, %v951_v32 }
  0x15   :  { %64 = vst.msk [vmem:[#allocation5 + $0x48] sm:$0xff] %vm43_vm0, %v951_v32 }
  0x16   :  { %65 = vst.msk [vmem:[#allocation5 + $0x50] sm:$0xff] %vm43_vm0, %v951_v32 }
  0x17   :  { %66 = vst.msk [vmem:[#allocation5 + $0x58] sm:$0xff] %vm43_vm0, %v951_v32 }
  0x18   :  { %67 = vst.msk [vmem:[#allocation5 + $0x60] sm:$0xff] %vm43_vm0, %v951_v32 }
  0x19   :  { %69 = vst.msk [vmem:[#allocation5 + $0x70] sm:$0xff] %vm43_vm0, %v951_v32 }
  0x1a   :  { %70 = vst.msk [vmem:[#allocation5 + $0x78] sm:$0xff] %vm43_vm0, %v951_v32 }
  0x1b   :  { %354 = vperm.xlu0 %717, %v267_v15   ;;  %71 = vst.msk [vmem:[#allocation5 + $0x80] sm:$0xff] %vm43_vm0, %v951_v32  ;;  %v216_v11 = vld [vmem:[#allocation5 + $0x40] sm:$0xff] }
  0x1c   :  { %351 = vperm.xlu2 %719, %v266_v16   ;;  %303 = vperm.xlu1 %718, %v250_v17   ;;  %72 = vst.msk [vmem:[#allocation5 + $0x88] sm:$0xff] %vm43_vm0, %v951_v32  ;;  %v217_v9 = vld [vmem:[#allocation5 + $0x48] sm:$0xff]  ;;  %v215_v16 = vld [vmem:[#allocation5 + $0x38] sm:$0xff] }
  0x1d   :  { %73 = vst.msk [vmem:[#allocation5 + $0x90] sm:$0xff] %vm43_vm0, %v951_v32  ;;  %v218_v4 = vld [vmem:[#allocation5 + $0x50] sm:$0xff] }
  0x1e   :  { %74 = vst.msk [vmem:[#allocation5 + $0x98] sm:$0xff] %vm43_vm0, %v951_v32  ;;  %v219_v63 = vld [vmem:[#allocation5 + $0x58] sm:$0xff] }
  0x1f   :  { %75 = vst.msk [vmem:[#allocation5 + $0xa0] sm:$0xff] %vm43_vm0, %v951_v32  ;;  %v220_v59 = vld [vmem:[#allocation5 + $0x60] sm:$0xff] }
  0x20   :  { %76 = vst.msk [vmem:[#allocation5 + $0xa8] sm:$0xff] %vm43_vm0, %v951_v32  ;;  %v222_v43 = vld [vmem:[#allocation5 + $0x70] sm:$0xff] }
  0x21   :  { %77 = vst.msk [vmem:[#allocation5 + $0xb0] sm:$0xff] %vm43_vm0, %v951_v32  ;;  %v223_v42 = vld [vmem:[#allocation5 + $0x78] sm:$0xff] }
  0x22   :  { %78 = vst.msk [vmem:[#allocation5 + $0xb8] sm:$0xff] %vm43_vm0, %v951_v32 }
  0x23   :  { %300 = vperm.xlu0 %717, %v249_v18   ;;  %79 = vst.msk [vmem:[#allocation5 + $0xc0] sm:$0xff] %vm43_vm0, %v951_v32 }
  0x24   :  { %348 = vperm.xlu1 %718, %v265_v19   ;;  %297 = vperm.xlu2 %719, %v248_v20   ;;  %80 = vst.msk [vmem:[#allocation5 + $0xc8] sm:$0xff] %vm43_vm0, %v951_v32 }
  0x25   :  { %81 = vst.msk [vmem:[#allocation5 + $0xd0] sm:$0xff] %vm43_vm0, %v951_v32 }
  0x26   :  { %82 = vst.msk [vmem:[#allocation5 + $0xd8] sm:$0xff] %vm43_vm0, %v951_v32 }
  0x27   :  { %83 = vst.msk [vmem:[#allocation5 + $0xe0] sm:$0xff] %vm43_vm0, %v951_v32 }
  0x28   :  { %84 = vst.msk [vmem:[#allocation5 + $0xe8] sm:$0xff] %vm43_vm0, %v951_v32 }
  0x29   :  { %85 = vst.msk [vmem:[#allocation5 + $0xf0] sm:$0xff] %vm43_vm0, %v951_v32  ;;  %v231_v17 = vld [vmem:[#allocation5 + $0xb8] sm:$0xff] }
  0x2a   :  { %86 = vst.msk [vmem:[#allocation5 + $0xf8] sm:$0xff] %vm43_vm0, %v951_v32  ;;  %v232_v15 = vld [vmem:[#allocation5 + $0xc0] sm:$0xff] }
  0x2b   :  { %345 = vperm.xlu0 %717, %v264_v21   ;;  %v233_v10 = vld [vmem:[#allocation5 + $0xc8] sm:$0xff]  ;;  %v214_v21 = vld [vmem:[#allocation5 + $0x30] sm:$0xff] }
  0x2c   :  { %342 = vperm.xlu2 %719, %v263_v22   ;;  %294 = vperm.xlu1 %718, %v247_v23   ;;  %v234_v5 = vld [vmem:[#allocation5 + $0xd0] sm:$0xff]  ;;  %v213_v23 = vld [vmem:[#allocation5 + $0x28] sm:$0xff] }
  0x2d   :  { %v235_v3 = vld [vmem:[#allocation5 + $0xd8] sm:$0xff]  ;;  %v230_v22 = vld [vmem:[#allocation5 + $0xb0] sm:$0xff] }
  0x2e   :  { %v236_v62 = vld [vmem:[#allocation5 + $0xe0] sm:$0xff] }
  0x2f   :  { %v237_v53 = vld [vmem:[#allocation5 + $0xe8] sm:$0xff] }
  0x30   :  { %v238_v50 = vld [vmem:[#allocation5 + $0xf0] sm:$0xff] }
  0x31   :  { %v239_v49 = vld [vmem:[#allocation5 + $0xf8] sm:$0xff] }
  0x33   :  { %291 = vperm.xlu0 %717, %v246_v24  }
  0x34   :  { %339 = vperm.xlu1 %718, %v262_v25   ;;  %288 = vperm.xlu2 %719, %v245_v26  }
  0x3b   :  { %336 = vperm.xlu0 %717, %v261_v27   ;;  %v229_v27 = vld [vmem:[#allocation5 + $0xa8] sm:$0xff] }
  0x3c   :  { %333 = vperm.xlu2 %719, %v260_v28   ;;  %285 = vperm.xlu1 %718, %v244_v29   ;;  %v212_v28 = vld [vmem:[#allocation5 + $0x20] sm:$0xff] }
  0x3d   :  { %v228_v29 = vld [vmem:[#allocation5 + $0xa0] sm:$0xff] }
  0x43   :  { %282 = vperm.xlu0 %717, %v243_v31  }
  0x44   :  { %330 = vperm.xlu1 %718, %v259_v33   ;;  %279 = vperm.xlu2 %719, %v242_v34   ;;  %v211_v34 = vld [vmem:[#allocation5 + $0x18] sm:$0xff] }
  0x4b   :  { %327 = vperm.xlu0 %717, %v258_v35   ;;  %v227_v35 = vld [vmem:[#allocation5 + $0x98] sm:$0xff] }
  0x4c   :  { %324 = vperm.xlu2 %719, %v257_v36   ;;  %276 = vperm.xlu1 %718, %v241_v37   ;;  %v210_v36 = vld [vmem:[#allocation5 + $0x10] sm:$0xff] }
  0x53   :  { %273 = vperm.xlu0 %717, %v240_v38  }
  0x54   :  { %321 = vperm.xlu1 %718, %v256_v39   ;;  %v226_v39 = vld [vmem:[#allocation5 + $0x90] sm:$0xff] }
  0x5e   :  { %v313_v40 = vpop.permute.xlu2 %312 }
  0x5f   :  { %vm381_vm3 = vcmp.eq.s32.totalorder %v221_v46, %v313_v40  ;;  %v209_v40 = vld [vmem:[#allocation5 + $0x8] sm:$0xff]  ;;  %v224_v46 = vld [vmem:[#allocation5 + $0x80] sm:$0xff] }
  0x66   :  { %v361_v41 = vpop.permute.xlu2 %360 }
  0x67   :  { %vm397_vm7 = vcmp.eq.s32.totalorder %v237_v53, %v361_v41  ;;  %v198_v53 = vld [vmem:[%s1133_s2] sm:$0x3] }
  0x68   :  { %v200_v55 = vperm.slane %v198_v53, 0 }
  0x6e   :  { %v307_v47 = vpop.permute.xlu2 %306 }
  0x6f   :  { %vm379_vm10 = vcmp.eq.s32.totalorder %v219_v63, %v307_v47 }
  0x75   :  { %v319_v44 = vpop.permute.xlu0 %318 }
  0x76   :  { %v316_v45 = vpop.permute.xlu1 %315  ;;  %vm383_vm1 = vcmp.eq.s32.totalorder %v223_v42, %v319_v44  ;;  %v352_v54 = vpop.permute.xlu2 %351  ;;  %v225_v42 = vld [vmem:[#allocation5 + $0x88] sm:$0xff] }
  0x77   :  { %vm382_vm2 = vcmp.eq.s32.totalorder %v222_v43, %v316_v45  ;;  %667 = vmatpush.msk.msra.mxu2 %vm383_vm1, %v786_v48  ;;  %vm394_vm13 = vcmp.eq.s32.totalorder %v234_v5, %v352_v54  ;;  %v208_v45 = vld [vmem:[#allocation5] sm:$0xff]  ;;  %v495_v5 = vld [vmem:[%s1138_s7 + $0x8] sm:$0xff] }
  0x78   :  { %516 = vmatpush.msrb.mxu0 %v495_v5 }
  0x79   :  { %668 = vmatpush.msk.msra.mxu2 %vm382_vm2, %v786_v48 }
  0x7b   :  { %669 = vmatpush.msk.msra.mxu2 %vm381_vm3, %v786_v48 }
  0x7d   :  { %v367_v51 = vpop.permute.xlu0 %366 }
  0x7e   :  { %v364_v52 = vpop.permute.xlu1 %363  ;;  %vm399_vm4 = vcmp.eq.s32.totalorder %v239_v49, %v367_v51  ;;  %v298_v2 = vpop.permute.xlu2 %297  ;;  %v47_v51 = vshrl.u32 %v46_v30, 7 }
  0x7f   :  { %vm398_vm6 = vcmp.eq.s32.totalorder %v238_v50, %v364_v52  ;;  %685 = vmatpush.msk.msra.mxu3 %vm399_vm4, %v786_v48  ;;  %vm376_vm1 = vcmp.eq.s32.totalorder %v216_v11, %v298_v2  ;;  %v191_v50 = vld [vmem:[%s1131_s0] sm:$0x3]  ;;  %v788_v2 = vmov 0.0  }
  0x80   :  { %v192_v52 = vperm.slane %v191_v50, 0  ;;  %v193_v54 = vperm.slane %v191_v50, 1  ;;  %44 = vst.msk [vmem:[#allocation2] sm:$0xff] %vm43_vm0, %v788_v2 }
  0x81   :  { %686 = vmatpush.msk.msra.mxu3 %vm398_vm6, %v786_v48  ;;  %45 = vst.msk [vmem:[#allocation2 + $0x8] sm:$0xff] %vm43_vm0, %v788_v2 }
  0x83   :  { %v112_v57 = vpop.f32.mrf.mxu0  ;;  %v161_v58 = vpop.f32.mrf.mxu1  ;;  %687 = vmatpush.msk.msra.mxu3 %vm397_vm7, %v786_v48 }
  0x84   :  { %v1045_v60 = vadd.f32 %v112_v57, %v88_v56  ;;  %v1047_v61 = vadd.f32 %v161_v58, %v88_v56  ;;  %v201_v56 = vperm.slane %v198_v53, 1  ;;  %v48_v57 = vadd.s32 8, %v47_v51  ;;  %v720_v53 = vld [vmem:[%s1139_s8] ss:$0 sm:$0xff]  ;;  %s790_s8 = smov [#allocation8]  }
  0x85   :  { %v310_v0 = vpop.permute.xlu0 %309  ;;  %s649_s3 = sshll.u32 %s790_s8, 4  ;;  %s650_s3 = int_to_ptr.vmem [resolvable:$true] %s649_s3 }
  0x86   :  { %v358_v1 = vpop.permute.xlu1 %357  ;;  %vm380_vm8 = vcmp.eq.s32.totalorder %v220_v59, %v310_v0  ;;  %164 = vmax.xlane.f32.xlu2 %v1047_v61  ;;  %115 = vmax.xlane.f32.xlu0 %v1045_v60  ;;  %v343_v12 = vpop.permute.xlu2 %342 }
  0x87   :  { %vm396_vm9 = vcmp.eq.s32.totalorder %v236_v62, %v358_v1  ;;  %670 = vmatpush.msk.msra.mxu2 %vm380_vm8, %v786_v48  ;;  %vm391_vm4 = vcmp.eq.s32.totalorder %v231_v17, %v343_v12  ;;  %v494_v12 = vld [vmem:[%s1138_s7] sm:$0xff] }
  0x88   :  { %688 = vmatpush.msk.msra.mxu3 %vm396_vm9, %v786_v48  ;;  %517 = vmatpush.msrb.mxu0 %v494_v12  ;;  %v605_v17 = vld [vmem:[%s1140_s9] sm:$0xff] }
  0x89   :  { %671 = vmatpush.msk.msra.mxu2 %vm379_vm10, %v786_v48 }
  0x8d   :  { %v355_v6 = vpop.permute.xlu0 %354 }
  0x8e   :  { %vm395_vm11 = vcmp.eq.s32.totalorder %v235_v3, %v355_v6  ;;  %v304_v7 = vpop.permute.xlu1 %303  ;;  %v289_v20 = vpop.permute.xlu2 %288 }
  0x8f   :  { %vm378_vm12 = vcmp.eq.s32.totalorder %v218_v4, %v304_v7  ;;  %689 = vmatpush.msk.msra.mxu3 %vm395_vm11, %v786_v48  ;;  %vm373_vm7 = vcmp.eq.s32.totalorder %v213_v23, %v289_v20  ;;  %v432_v4 = vld [vmem:[#allocation2] sm:$0xff] }
  0x90   :  { %672 = vmatpush.msk.msra.mxu2 %vm378_vm12, %v786_v48 }
  0x91   :  { %690 = vmatpush.msk.msra.mxu3 %vm394_vm13, %v786_v48 }
  0x95   :  { %v301_v13 = vpop.permute.xlu0 %300 }
  0x96   :  { %v349_v14 = vpop.permute.xlu1 %348  ;;  %vm377_vm14 = vcmp.eq.s32.totalorder %v217_v9, %v301_v13  ;;  %v334_v26 = vpop.permute.xlu2 %333  ;;  %v433_v9 = vld [vmem:[#allocation2 + $0x8] sm:$0xff] }
  0x97   :  { %vm393_vm15 = vcmp.eq.s32.totalorder %v233_v10, %v349_v14  ;;  %673 = vmatpush.msk.msra.mxu2 %vm377_vm14, %v786_v48  ;;  %vm388_vm10 = vcmp.eq.s32.totalorder %v228_v29, %v334_v26  ;;  %v492_v14 = vld [vmem:[%s1137_s6] sm:$0xff] }
  0x98   :  { %691 = vmatpush.msk.msra.mxu3 %vm393_vm15, %v786_v48  ;;  %703 = vmatmul.msk.f32.vlgmr.msrb.gmra.mxu0 %vm43_vm0, %v492_v14 }
  0x99   :  { %674 = vmatpush.msk.msra.mxu2 %vm376_vm1, %v786_v48 }
  0x9d   :  { %v346_v18 = vpop.permute.xlu0 %345 }
  0x9e   :  { %vm392_vm2 = vcmp.eq.s32.totalorder %v232_v15, %v346_v18  ;;  %v295_v19 = vpop.permute.xlu1 %294  ;;  %v280_v33 = vpop.permute.xlu2 %279  ;;  %v493_v15 = vld [vmem:[%s1137_s6 + $0x8] sm:$0xff] }
  0x9f   :  { %vm375_vm3 = vcmp.eq.s32.totalorder %v215_v16, %v295_v19  ;;  %692 = vmatpush.msk.msra.mxu3 %vm392_vm2, %v786_v48  ;;  %vm370_vm13 = vcmp.eq.s32.totalorder %v210_v36, %v280_v33  ;;  %v606_v16 = vld [vmem:[%s1140_s9 + $0x8] sm:$0xff] }
  0xa0   :  { %675 = vmatpush.msk.msra.mxu2 %vm375_vm3, %v786_v48  ;;  %704 = vmatmul.msk.f32.gmra.mxu0 %vm43_vm0, %v493_v15 }
  0xa1   :  { %693 = vmatpush.msk.msra.mxu3 %vm391_vm4, %v786_v48  ;;  %vm194_vm4 = vcmp.eq.s32.totalorder %v47_v51, %v192_v52  ;;  %624 = vmatpush.msra.mxu0 %v606_v16 }
  0xa3   :  { %625 = vmatpush.msra.mxu0 %v605_v17 }
  0xa5   :  { %v292_v24 = vpop.permute.xlu0 %291 }
  0xa6   :  { %v340_v25 = vpop.permute.xlu1 %339  ;;  %vm374_vm5 = vcmp.eq.s32.totalorder %v214_v21, %v292_v24  ;;  %v325_v41 = vpop.permute.xlu2 %324 }
  0xa7   :  { %vm390_vm6 = vcmp.eq.s32.totalorder %v230_v22, %v340_v25  ;;  %676 = vmatpush.msk.msra.mxu2 %vm374_vm5, %v786_v48  ;;  %vm385_vm1 = vcmp.eq.s32.totalorder %v225_v42, %v325_v41  ;;  %vm195_vm5 = vcmp.eq.s32.totalorder %v47_v51, %v193_v54 }
  0xa8   :  { %694 = vmatpush.msk.msra.mxu3 %vm390_vm6, %v786_v48  ;;  %vm196_vm6 = vcmp.eq.s32.totalorder %v48_v57, %v192_v52  ;;  %707 = vmatmul.msk.f32.vlgmr.msra.gmra.mxu0 %vm43_vm0, %v878_v8 }
  0xa9   :  { %677 = vmatpush.msk.msra.mxu2 %vm373_vm7, %v786_v48  ;;  %vm197_vm7 = vcmp.eq.s32.totalorder %v48_v57, %v193_v54 }
  0xad   :  { %v337_v31 = vpop.permute.xlu0 %336 }
  0xae   :  { %vm389_vm8 = vcmp.eq.s32.totalorder %v229_v27, %v337_v31  ;;  %v286_v32 = vpop.permute.xlu1 %285 }
  0xaf   :  { %vm372_vm9 = vcmp.eq.s32.totalorder %v212_v28, %v286_v32  ;;  %695 = vmatpush.msk.msra.mxu3 %vm389_vm8, %v786_v48 }
  0xb0   :  { %678 = vmatpush.msk.msra.mxu2 %vm372_vm9, %v786_v48 }
  0xb1   :  { %696 = vmatpush.msk.msra.mxu3 %vm388_vm10, %v786_v48 }
  0xb5   :  { %v283_v37 = vpop.permute.xlu0 %282 }
  0xb6   :  { %v331_v38 = vpop.permute.xlu1 %330  ;;  %vm371_vm11 = vcmp.eq.s32.totalorder %v211_v34, %v283_v37 }
  0xb7   :  { %vm387_vm12 = vcmp.eq.s32.totalorder %v227_v35, %v331_v38  ;;  %679 = vmatpush.msk.msra.mxu2 %vm371_vm11, %v786_v48 }
  0xb8   :  { %697 = vmatpush.msk.msra.mxu3 %vm387_vm12, %v786_v48 }
  0xb9   :  { %680 = vmatpush.msk.msra.mxu2 %vm370_vm13, %v786_v48 }
  0xbd   :  { %v328_v43 = vpop.permute.xlu0 %327 }
  0xbe   :  { %vm386_vm14 = vcmp.eq.s32.totalorder %v226_v39, %v328_v43  ;;  %v277_v44 = vpop.permute.xlu1 %276 }
  0xbf   :  { %vm369_vm15 = vcmp.eq.s32.totalorder %v209_v40, %v277_v44  ;;  %698 = vmatpush.msk.msra.mxu3 %vm386_vm14, %v786_v48 }
  0xc0   :  { %681 = vmatpush.msk.msra.mxu2 %vm369_vm15, %v786_v48 }
  0xc1   :  { %699 = vmatpush.msk.msra.mxu3 %vm385_vm1, %v786_v48 }
  0xc5   :  { %v274_v47 = vpop.permute.xlu0 %273 }
  0xc6   :  { %v322_v49 = vpop.permute.xlu1 %321  ;;  %vm368_vm2 = vcmp.eq.s32.totalorder %v208_v45, %v274_v47 }
  0xc7   :  { %vm384_vm3 = vcmp.eq.s32.totalorder %v224_v46, %v322_v49  ;;  %682 = vmatpush.msk.msra.mxu2 %vm368_vm2, %v786_v48  ;;  %v789_v46 = vmov 16.0  }
  0xc8   :  { %700 = vmatpush.msk.msra.mxu3 %vm384_vm3, %v786_v48  ;;  %683 = vmatmul.msk.f32.vlgmr.msra.gmra.mxu2 %vm194_vm4, %v200_v55 }
  0xc9   :  { %701 = vmatmul.msk.f32.vlgmr.msra.gmra.mxu3 %vm195_vm5, %v201_v56 }
  0xd0   :  { %684 = vmatmul.msk.f32.gmra.mxu2 %vm196_vm6, %v200_v55 }
  0xd1   :  { %702 = vmatmul.msk.f32.gmra.mxu3 %vm197_vm7, %v201_v56 }
  0xf9   :  { %v165_v48 = vpop.xlane.xlu2 %164  ;;  %v116_v58 = vpop.xlane.xlu0 %115 }
  0xfa   :  { %v166_v30 = vsub.f32 %v1047_v61, %v165_v48  ;;  %v117_v59 = vsub.f32 %v1045_v60, %v116_v58 }
  0xfc   :  { %v167_v62 = vmul.f32 1.442695, %v166_v30  ;;  %v118_v63 = vmul.f32 1.442695, %v117_v59 }
  0xfe   :  { %721 = vpow2.f32 %v167_v62 }
  0xff   :  { %723 = vpow2.f32 %v118_v63 }
 0x104   :  { %v1086_v0 = vpop.eup %721 }
 0x105   :  { %v1088_v1 = vpop.eup %723  ;;  %169 = vadd.xlane.f32.xlu1 %v1086_v0 }
 0x106   :  { %120 = vadd.xlane.f32.xlu2 %v1088_v1 }
 0x115   :  { %v519_v44 = vpop.f32.mrf.mxu0 }
 0x11d   :  { %v522_v49 = vpop.f32.mrf.mxu0 }
 0x125   :  { %v627_v14 = vpop.f32.mrf.mxu0 }
 0x126   :  { %630 = vst [vmem:[#allocation8] sm:$0xff] %v627_v14 }
 0x127   :  { %654 = dma.vmem_to_hbm [thread:$0]  %s650_s3, 128, %s652_s18, [#allocation9]  }
 0x14b   :  { %v451_v61 = vpop.f32.mrf.mxu2 }
 0x14c   :  { %v474_v3 = vpop.f32.mrf.mxu3 }
 0x14d   :  { %v475_v60 = vadd.f32 %v474_v3, %v451_v61 }
 0x14f   :  { %v480_v6 = vadd.f32 %v475_v60, %v432_v4 }
 0x151   :  { %483 = vst.msk [vmem:[#allocation2] sm:$0xff] %vm43_vm0, %v480_v6 }
 0x153   :  { %v454_v7 = vpop.f32.mrf.mxu2 }
 0x154   :  { %v477_v10 = vpop.f32.mrf.mxu3 }
 0x155   :  { %v478_v11 = vadd.f32 %v477_v10, %v454_v7 }
 0x157   :  { %v481_v13 = vadd.f32 %v478_v11, %v433_v9 }
 0x158   :  { %v488_v42 = vld [vmem:[#allocation2] sm:$0xff] }
 0x159   :  { %484 = vst.msk [vmem:[#allocation2 + $0x8] sm:$0xff] %vm43_vm0, %v481_v13 }
 0x160   :  { %v489_v43 = vld [vmem:[#allocation2 + $0x8] sm:$0xff] }
 0x178   :  { %v170_v18 = vpop.xlane.xlu1 %169 }
 0x179   :  { %725 = vrcp.f32 %v170_v18  ;;  %v121_v19 = vpop.xlane.xlu2 %120  ;;  %v182_v25 = vand.u32 2147483648, %v170_v18  ;;  %v180_v29 = vand.u32 2147483647, %v170_v18  ;;  %vm176_vm10 = vweird.f32 %v170_v18 }
 0x17a   :  { %727 = vrcp.f32 %v121_v19  ;;  %v133_v28 = vand.u32 2147483648, %v121_v19  ;;  %v131_v32 = vand.u32 2147483647, %v121_v19  ;;  %vm127_vm12 = vweird.f32 %v121_v19 }
 0x17b   :  { %v183_v34 = vor.u32 1.1754944e-38, %v182_v25  ;;  %vm181_vm14 = vcmp.eq.f32.partialorder %v180_v29, 8.507059e+37  ;;  %729 = vrcp.f32 %v789_v46 }
 0x17c   :  { %v134_v8 = vor.u32 1.1754944e-38, %v133_v28  ;;  %vm132_vm15 = vcmp.eq.f32.partialorder %v131_v32, 8.507059e+37 }
 0x17f   :  { %v726_v20 = vpop.eup %725 }
 0x180   :  { %v728_v21 = vpop.eup %727  ;;  %v172_v22 = vmul.f32 %v726_v20, %v170_v18  ;;  %vm177_vm8 = vweird.f32 %v726_v20 }
 0x181   :  { %v123_v23 = vmul.f32 %v728_v21, %v121_v19  ;;  %vm128_vm9 = vweird.f32 %v728_v21  ;;  %vm178_vm11 = vmor %vm176_vm10, %vm177_vm8  ;;  %v730_v50 = vpop.eup %729 }
 0x182   :  { %v173_v24 = vsub.f32 1.0, %v172_v22  ;;  %vm129_vm13 = vmor %vm127_vm12, %vm128_vm9  ;;  %v570_v55 = vmul.f32 16.0, %v730_v50 }
 0x183   :  { %v124_v26 = vsub.f32 1.0, %v123_v23 }
 0x184   :  { %v174_v27 = vmul.f32 %v726_v20, %v173_v24  ;;  %v571_v58 = vsub.f32 1.0, %v570_v55 }
 0x185   :  { %v125_v31 = vmul.f32 %v728_v21, %v124_v26 }
 0x186   :  { %v175_v33 = vadd.f32 %v726_v20, %v174_v27  ;;  %v572_v62 = vmul.f32 %v730_v50, %v571_v58 }
 0x187   :  { %v126_v35 = vadd.f32 %v728_v21, %v125_v31 }
 0x188   :  { %v179_v36 = vsel %vm178_vm11, %v726_v20, %v175_v33 }
 0x189   :  { %v184_v37 = vsel %vm181_vm14, %v183_v34, %v179_v36  ;;  %v130_v38 = vsel %vm129_vm13, %v728_v21, %v126_v35 }
 0x18a   :  { %v185_v39 = vmul.f32 %v1086_v0, %v184_v37  ;;  %v135_v40 = vsel %vm132_vm15, %v134_v8, %v130_v38 }
 0x18b   :  { %v136_v41 = vmul.f32 %v1088_v1, %v135_v40  ;;  %v573_v1 = vadd.f32 %v730_v50, %v572_v62 }
 0x18c   :  { %545 = vmatpush.msrb.mxu1 %v185_v39 }
 0x18e   :  { %546 = vmatpush.msrb.mxu1 %v136_v41 }
 0x18f   :  { %705 = vmatmul.msk.f32.vlgmr.msrb.gmra.mxu1 %vm43_vm0, %v488_v42 }
 0x197   :  { %706 = vmatmul.msk.f32.gmra.mxu1 %vm43_vm0, %v489_v43  ;;  %vm574_vm0 = vweird.f32 %v730_v50 }
 0x198   :  { %v575_v3 = vsel %vm574_vm0, %v730_v50, %v573_v1 }
 0x20c   :  { %v548_v45 = vpop.f32.mrf.mxu1 }
 0x20d   :  { %v549_v47 = vadd.f32 %v548_v45, %v519_v44 }
 0x20f   :  { %v554_v52 = vmul.f32 0.33333334, %v549_v47 }
 0x211   :  { %v560_v57 = vadd.f32 %v720_v53, %v554_v52 }
 0x214   :  { %v551_v51 = vpop.f32.mrf.mxu1 }
 0x215   :  { %v552_v54 = vadd.f32 %v551_v51, %v522_v49 }
 0x217   :  { %v555_v56 = vmul.f32 0.33333334, %v552_v54 }
 0x219   :  { %v561_v48 = vadd.f32 %v720_v53, %v555_v56 }
 0x21b   :  { %v562_v30 = vadd.f32 %v561_v48, %v560_v57 }
 0x21d   :  { %v563_v59 = vrot.slane %v562_v30, 4 }
 0x21f   :  { %v564_v63 = vadd.f32 %v563_v59, %v562_v30 }
 0x221   :  { %v565_v0 = vrot.slane %v564_v63, 2 }
 0x223   :  { %v566_v2 = vadd.f32 %v565_v0, %v564_v63 }
 0x225   :  { %v567_v61 = vrot.slane %v566_v2, 1 }
 0x227   :  { %v568_v60 = vadd.f32 %v567_v61, %v566_v2 }
 0x229   :  { %v576_v4 = vmul.f32 %v575_v3, %v568_v60 }
 0x22b   :  { %v577_v5 = vsub.f32 %v560_v57, %v576_v4  ;;  %v578_v6 = vsub.f32 %v561_v48, %v576_v4 }
 0x22d   :  { %v579_v7 = vmul.f32 %v577_v5, %v577_v5  ;;  %v580_v9 = vmul.f32 %v578_v6, %v578_v6 }
 0x22f   :  { %v581_v10 = vadd.f32 %v580_v9, %v579_v7 }
 0x231   :  { %v582_v11 = vrot.slane %v581_v10, 4 }
 0x233   :  { %v583_v12 = vadd.f32 %v582_v11, %v581_v10 }
 0x235   :  { %v584_v13 = vrot.slane %v583_v12, 2 }
 0x237   :  { %v585_v15 = vadd.f32 %v584_v13, %v583_v12 }
 0x239   :  { %v586_v16 = vrot.slane %v585_v15, 1 }
 0x23b   :  { %v587_v17 = vadd.f32 %v586_v16, %v585_v15 }
 0x23d   :  { %v588_v18 = vmul.f32 %v587_v17, %v575_v3 }
 0x23f   :  { %v589_v19 = vadd.f32 1e-05, %v588_v18 }
 0x241   :  { %731 = vrsqrt.f32 %v589_v19  ;;  %vm596_vm2 = vweird.f32 %v589_v19 }
 0x247   :  { %v732_v20 = vpop.eup %731 }
 0x248   :  { %v591_v21 = vmul.f32 %v732_v20, %v589_v19  ;;  %vm597_vm1 = vweird.f32 %v732_v20 }
 0x249   :  { %vm598_vm3 = vmor %vm596_vm2, %vm597_vm1 }
 0x24a   :  { %v592_v22 = vmul.f32 %v732_v20, %v591_v21 }
 0x24c   :  { %v593_v23 = vmul.f32 0.5, %v592_v22 }
 0x24e   :  { %v594_v24 = vsub.f32 1.5, %v593_v23 }
 0x250   :  { %v595_v25 = vmul.f32 %v732_v20, %v594_v24 }
 0x252   :  { %v599_v26 = vsel %vm598_vm3, %v732_v20, %v595_v25 }
 0x253   :  { %v601_v27 = vmul.f32 %v599_v26, %v578_v6  ;;  %v600_v28 = vmul.f32 %v599_v26, %v577_v5 }
 0x255   :  { %603 = vst [vmem:[#allocation6 + $0x8] sm:$0xff] %v601_v27 }
 0x256   :  { %602 = vst [vmem:[#allocation6] sm:$0xff] %v600_v28 }
 0x257   :  { %643 = dma.vmem_to_hbm [thread:$0]  %s636_s19, 256, %s638_s22, [#allocation7], %s792_s23, %s792_s23, %s793_s24  }
 0x258   :  { %781 = dma.done.wait [#allocation7], 256  }
 0x259   :  { %782 = vsyncadd [#allocation7], 4294967040 }
 0x25a   :  { %783 = dma.done.wait [#allocation9], 128  }
 0x25b   :  { %784 = vsyncadd [#allocation9], 4294967168 }
 0x25c   :  { %663 = vsyncpa [#allocation7], 1 }
 0x25d   :  { %664 = vsyncpa [#allocation9], 1 }

</bundles_post_ra>
